<compile_context>
chip_gen: v7x
topology: tpu7x:2x2x1
jax: 0.10.0
libtpu: 0.0.40
codegen_flags: <defaults>
</compile_context>

<pallas_src>
import functools

import jax
import jax.numpy as jnp
from jax.experimental import pallas as pl
from jax.experimental.pallas import tpu as pltpu

SUBLANES = 8            # f32 sublanes per vreg
LANES = 128             # lanes per vreg
MAX_LAYERS_PER_BLOCK = 8


def _round_up(x, m):
    return ((x + m - 1) // m) * m


def mlp_residual_kernel(x_ref,      # (B_pad, D_in)               resident
                        w_in_ref,   # (D_in, H)                   resident
                        b_in_ref,   # (1, H)                      resident
                        slab_ref,   # (l_blk, 2H+16, H)  this block's layers
                        w_out_ref,  # (H, C_pad)                  resident
                        b_out_ref,  # (1, C_pad)                  resident
                        o_ref,      # (B_pad, C_pad)              output
                        h_ref,      # (B_pad, H) VMEM scratch (carries h)
                        *, hidden, l_blk):
    g = pl.program_id(0)

    # First grid step: input_fc + ReLU into the persistent scratch.
    @pl.when(g == 0)
    def _():
        h0 = jnp.dot(x_ref[...], w_in_ref[...],
                     preferred_element_type=jnp.float32) + b_in_ref[...]
        h_ref[...] = jnp.maximum(h0, 0.0)

    # l_blk residual blocks out of this grid step's fused weight slab.
    # Slab layout per layer: rows [0,H)=w1, [H,2H)=w2, row 2H=b1, row 2H+8=b2.
    h = h_ref[...]
    for i in range(l_blk):  # small static trip count -> fully unrolled
        w1 = slab_ref[i, pl.ds(0, hidden), :]
        w2 = slab_ref[i, pl.ds(hidden, hidden), :]
        b1 = slab_ref[i, pl.ds(2 * hidden, 1), :]
        b2 = slab_ref[i, pl.ds(2 * hidden + SUBLANES, 1), :]
        out = jnp.dot(h, w1, preferred_element_type=jnp.float32) + b1
        out = jnp.maximum(out, 0.0)
        out = jnp.dot(out, w2, preferred_element_type=jnp.float32) + b2
        h = jnp.maximum(out + h, 0.0)
    h_ref[...] = h

    # Last grid step: output_fc (no activation), lane-dense padded classes.
    @pl.when(g == pl.num_programs(0) - 1)
    def _():
        o_ref[...] = jnp.dot(h, w_out_ref[...],
                             preferred_element_type=jnp.float32) + b_out_ref[...]


def pack_params(params, *, num_layers):
    """Build kernel-layout parameters ONCE (slab packing + lane padding)."""
    assert num_layers >= 1
    w_in, b_in, w1, b1, w2, b2, w_out, b_out = params
    hidden = w_in.shape[1]
    num_classes = w_out.shape[1]

    l_blk = min(num_layers, MAX_LAYERS_PER_BLOCK)
    l_pad = _round_up(num_layers, l_blk)
    c_pad = _round_up(max(num_classes, LANES), LANES)
    slab_rows = 2 * hidden + 2 * SUBLANES

    # Fused per-layer slab; layers >= num_layers stay all-zero, which is an
    # exact identity residual block because h >= 0 after the previous ReLU.
    slab = jnp.zeros((l_pad, slab_rows, hidden), jnp.float32)
    slab = slab.at[:num_layers, 0:hidden, :].set(w1)
    slab = slab.at[:num_layers, hidden:2 * hidden, :].set(w2)
    slab = slab.at[:num_layers, 2 * hidden, :].set(b1)
    slab = slab.at[:num_layers, 2 * hidden + SUBLANES, :].set(b2)

    w_out_p = jnp.pad(w_out, ((0, 0), (0, c_pad - num_classes)))
    b_out_p = jnp.pad(b_out, ((0, 0), (0, c_pad - num_classes)))

    return dict(w_in=w_in, b_in=b_in, slab=slab, w_out=w_out_p, b_out=b_out_p,
                l_blk=l_blk, hidden=hidden, num_classes=num_classes)


def mlp_classifier_deep_residual(x_nchw, packed):
    """x_nchw: (B, 3, H, W) float32 -> logits (B, num_classes)."""
    w_in, b_in = packed["w_in"], packed["b_in"]
    slab = packed["slab"]
    w_out, b_out = packed["w_out"], packed["b_out"]
    l_blk, hidden = packed["l_blk"], packed["hidden"]
    num_classes = packed["num_classes"]

    l_pad, slab_rows, _ = slab.shape
    num_blocks = l_pad // l_blk
    in_dim = w_in.shape[0]
    c_pad = w_out.shape[1]

    b = x_nchw.shape[0]
    b_pad = _round_up(max(b, SUBLANES), SUBLANES)

    x_flat = x_nchw.reshape(b, -1)
    if b_pad != b:
        x_flat = jnp.pad(x_flat, ((0, b_pad - b), (0, 0)))

    # Deeper weight-stream buffering only pays when the layer grid is deep.
    if num_blocks > 2:
        slab_spec = pl.BlockSpec((l_blk, slab_rows, hidden),
                                 lambda g: (g, 0, 0),
                                 pipeline_mode=pl.Buffered(3))
    else:
        slab_spec = pl.BlockSpec((l_blk, slab_rows, hidden),
                                 lambda g: (g, 0, 0))

    flops = 2 * b_pad * (in_dim * hidden
                         + l_pad * 2 * hidden * hidden
                         + hidden * c_pad)
    bytes_accessed = 4 * (b_pad * in_dim + in_dim * hidden + hidden
                          + l_pad * slab_rows * hidden
                          + hidden * c_pad + c_pad + b_pad * c_pad)

    grid_spec = pltpu.PrefetchScalarGridSpec(
        num_scalar_prefetch=0,
        grid=(num_blocks,),
        in_specs=[
            pl.BlockSpec((b_pad, in_dim), lambda g: (0, 0)),    # x       resident
            pl.BlockSpec((in_dim, hidden), lambda g: (0, 0)),   # w_in    resident
            pl.BlockSpec((1, hidden), lambda g: (0, 0)),        # b_in    resident
            slab_spec,                                          # fused layer slab
            pl.BlockSpec((hidden, c_pad), lambda g: (0, 0)),    # w_out   resident
            pl.BlockSpec((1, c_pad), lambda g: (0, 0)),         # b_out   resident
        ],
        out_specs=pl.BlockSpec((b_pad, c_pad), lambda g: (0, 0)),
        scratch_shapes=[pltpu.VMEM((b_pad, hidden), jnp.float32)],
    )

    kernel = functools.partial(mlp_residual_kernel, hidden=hidden, l_blk=l_blk)

    logits_padded = pl.pallas_call(
        kernel,
        out_shape=jax.ShapeDtypeStruct((b_pad, c_pad), jnp.float32),
        grid_spec=grid_spec,
        compiler_params=pltpu.CompilerParams(
            dimension_semantics=("arbitrary",)),   # serial layer chain
        cost_estimate=pl.CostEstimate(flops=flops, transcendentals=0,
                                      bytes_accessed=bytes_accessed),
    )(x_flat, w_in, b_in, slab, w_out, b_out)

    return logits_padded[:b, :num_classes]


def init_params(key, in_dim, hidden_dim, num_classes, num_layers):
    """nn.Linear-style U(-1/sqrt(fan_in)) init; weights stored as (in, out)
    (transposed vs torch's (out, in)) so the kernel computes x @ W + b."""
    keys = jax.random.split(key, 4 + 4 * num_layers)
    k = iter(keys)

    def linear(key_w, key_b, fan_in, fan_out):
        bound = 1.0 / jnp.sqrt(jnp.float32(fan_in))
        w = jax.random.uniform(key_w, (fan_in, fan_out), jnp.float32,
                               -bound, bound)
        bb = jax.random.uniform(key_b, (fan_out,), jnp.float32, -bound, bound)
        return w, bb

    w_in, b_in = linear(next(k), next(k), in_dim, hidden_dim)

    w1s, b1s, w2s, b2s = [], [], [], []
    for _ in range(num_layers):
        w1, b1 = linear(next(k), next(k), hidden_dim, hidden_dim)
        w2, b2 = linear(next(k), next(k), hidden_dim, hidden_dim)
        w1s.append(w1); b1s.append(b1); w2s.append(w2); b2s.append(b2)

    w_out, b_out = linear(next(k), next(k), hidden_dim, num_classes)
    return (w_in, b_in[None, :],
            jnp.stack(w1s), jnp.stack(b1s), jnp.stack(w2s), jnp.stack(b2s),
            w_out, b_out[None, :])


def reference_forward(x_nchw, params, *, num_layers):
    """Pure-JAX reference of the PyTorch forward pass."""
    w_in, b_in, w1, b1, w2, b2, w_out, b_out = params
    b = x_nchw.shape[0]
    h = jnp.maximum(x_nchw.reshape(b, -1) @ w_in + b_in, 0.0)
    for l in range(num_layers):
        out = jnp.maximum(h @ w1[l] + b1[l], 0.0)
        out = out @ w2[l] + b2[l]
        h = jnp.maximum(out + h, 0.0)
    return h @ w_out + b_out


if __name__ == "__main__":
    # Small shapes consistent with the module: h=w=16 images, 3 channels.
    B, C_IN, H, W = 2, 3, 16, 16
    HIDDEN = 128
    NUM_CLASSES = 6
    NUM_LAYERS = 3
    IN_DIM = C_IN * H * W  # 768

    key = jax.random.PRNGKey(0)
    k_x, k_p = jax.random.split(key)
    x = jax.random.normal(k_x, (B, C_IN, H, W), jnp.float32)
    params = init_params(k_p, IN_DIM, HIDDEN, NUM_CLASSES, NUM_LAYERS)
    packed = pack_params(params, num_layers=NUM_LAYERS)

    logits = mlp_classifier_deep_residual(x, packed)
    logits = jax.block_until_ready(logits)

    ref = reference_forward(x, params, num_layers=NUM_LAYERS)
    assert logits.shape == (B, NUM_CLASSES)
    assert jnp.allclose(logits, ref, atol=1e-4, rtol=1e-4), "mismatch vs reference"

    print("KERNEL_OK")
</pallas_src>

<mosaic_0001>
module attributes {stable_mosaic.version = 11 : i64} {
  func.func @mlp_residual_kernel(%arg0: i32, %arg1: memref<8x768xf32, #tpu.memory_space<vmem>>, %arg2: memref<768x128xf32, #tpu.memory_space<vmem>>, %arg3: memref<1x128xf32, #tpu.memory_space<vmem>>, %arg4: memref<3x272x128xf32, #tpu.memory_space<vmem>>, %arg5: memref<128x128xf32, #tpu.memory_space<vmem>>, %arg6: memref<1x128xf32, #tpu.memory_space<vmem>>, %arg7: memref<8x128xf32, #tpu.memory_space<vmem>>, %arg8: memref<8x128xf32, #tpu.memory_space<vmem>>) attributes {dimension_semantics = [#tpu.dimension_semantics<arbitrary>], iteration_bounds = array<i64: 1>, scalar_prefetch = 0 : i64, scratch_operands = 1 : i64, tpu.core_type = #tpu.core_type<tc>, window_params = [{pipeline_mode = #tpu.pipeline_mode<synchronous>, transform_indices = @transform_0, window_bounds = array<i64: 8, 768>}, {pipeline_mode = #tpu.pipeline_mode<synchronous>, transform_indices = @transform_1, window_bounds = array<i64: 768, 128>}, {pipeline_mode = #tpu.pipeline_mode<synchronous>, transform_indices = @transform_2, window_bounds = array<i64: 1, 128>}, {transform_indices = @transform_3, window_bounds = array<i64: 3, 272, 128>}, {pipeline_mode = #tpu.pipeline_mode<synchronous>, transform_indices = @transform_4, window_bounds = array<i64: 128, 128>}, {pipeline_mode = #tpu.pipeline_mode<synchronous>, transform_indices = @transform_5, window_bounds = array<i64: 1, 128>}, {pipeline_mode = #tpu.pipeline_mode<synchronous>, transform_indices = @transform_6, window_bounds = array<i64: 8, 128>}]} {
    %c0_i32 = arith.constant 0 : i32
    %0 = arith.cmpi eq, %arg0, %c0_i32 : i32
    %1 = arith.extui %0 : i1 to i32
    %c0_i32_0 = arith.constant 0 : i32
    %2 = arith.cmpi ne, %1, %c0_i32_0 : i32
    scf.if %2 {
      %c0_48 = arith.constant 0 : index
      %c0_49 = arith.constant 0 : index
      %65 = vector.load %arg1[%c0_48, %c0_49] : memref<8x768xf32, #tpu.memory_space<vmem>>, vector<8x768xf32>
      %c0_50 = arith.constant 0 : index
      %c0_51 = arith.constant 0 : index
      %66 = vector.load %arg2[%c0_50, %c0_51] : memref<768x128xf32, #tpu.memory_space<vmem>>, vector<768x128xf32>
      %cst_52 = arith.constant dense<0.000000e+00> : vector<8x128xf32>
      %67 = tpu.matmul %65, %66, %cst_52 {dimension_numbers = #tpu.dot_dimension_numbers<[1], [0], [0], [1], [0, 0, 1, 1], [], []>} : vector<8x768xf32>, vector<768x128xf32>, vector<8x128xf32> -> vector<8x128xf32>
      %c0_53 = arith.constant 0 : index
      %c0_54 = arith.constant 0 : index
      %68 = vector.load %arg3[%c0_53, %c0_54] : memref<1x128xf32, #tpu.memory_space<vmem>>, vector<1x128xf32>
      %69 = vector.broadcast %68 : vector<1x128xf32> to vector<8x128xf32>
      %70 = arith.addf %67, %69 : vector<8x128xf32>
      %cst_55 = arith.constant 0.000000e+00 : f32
      %71 = vector.broadcast %cst_55 : f32 to vector<8x128xf32>
      %72 = arith.maximumf %70, %71 : vector<8x128xf32>
      %c0_56 = arith.constant 0 : index
      %c0_57 = arith.constant 0 : index
      %73 = vector.load %arg8[%c0_56, %c0_57] : memref<8x128xf32, #tpu.memory_space<vmem>>, vector<8x128xf32>
      tpu.vector_store %arg8[%c0_56, %c0_57], %72 {strides = array<i32>} : memref<8x128xf32, #tpu.memory_space<vmem>>, vector<8x128xf32>,
    } else {
    }
    %c0 = arith.constant 0 : index
    %c0_1 = arith.constant 0 : index
    %3 = vector.load %arg8[%c0, %c0_1] : memref<8x128xf32, #tpu.memory_space<vmem>>, vector<8x128xf32>
    %c0_2 = arith.constant 0 : index
    %c0_3 = arith.constant 0 : index
    %c0_4 = arith.constant 0 : index
    %4 = vector.load %arg4[%c0_2, %c0_3, %c0_4] : memref<3x272x128xf32, #tpu.memory_space<vmem>>, vector<1x128x128xf32>
    %5 = vector.shape_cast %4 : vector<1x128x128xf32> to vector<128x128xf32>
    %c0_5 = arith.constant 0 : index
    %c128 = arith.constant 128 : index
    %c0_6 = arith.constant 0 : index
    %6 = vector.load %arg4[%c0_5, %c128, %c0_6] : memref<3x272x128xf32, #tpu.memory_space<vmem>>, vector<1x128x128xf32>
    %7 = vector.shape_cast %6 : vector<1x128x128xf32> to vector<128x128xf32>
    %c0_7 = arith.constant 0 : index
    %c256 = arith.constant 256 : index
    %c0_8 = arith.constant 0 : index
    %8 = vector.load %arg4[%c0_7, %c256, %c0_8] : memref<3x272x128xf32, #tpu.memory_space<vmem>>, vector<1x1x128xf32>
    %9 = vector.shape_cast %8 : vector<1x1x128xf32> to vector<1x128xf32>
    %c0_9 = arith.constant 0 : index
    %c264 = arith.constant 264 : index
    %c0_10 = arith.constant 0 : index
    %10 = vector.load %arg4[%c0_9, %c264, %c0_10] : memref<3x272x128xf32, #tpu.memory_space<vmem>>, vector<1x1x128xf32>
    %11 = vector.shape_cast %10 : vector<1x1x128xf32> to vector<1x128xf32>
    %cst = arith.constant dense<0.000000e+00> : vector<8x128xf32>
    %12 = tpu.matmul %3, %5, %cst {dimension_numbers = #tpu.dot_dimension_numbers<[1], [0], [0], [1], [0, 0, 1, 1], [], []>} : vector<8x128xf32>, vector<128x128xf32>, vector<8x128xf32> -> vector<8x128xf32>
    %13 = vector.broadcast %9 : vector<1x128xf32> to vector<8x128xf32>
    %14 = arith.addf %12, %13 : vector<8x128xf32>
    %cst_11 = arith.constant 0.000000e+00 : f32
    %15 = vector.broadcast %cst_11 : f32 to vector<8x128xf32>
    %16 = arith.maximumf %14, %15 : vector<8x128xf32>
    %cst_12 = arith.constant dense<0.000000e+00> : vector<8x128xf32>
    %17 = tpu.matmul %16, %7, %cst_12 {dimension_numbers = #tpu.dot_dimension_numbers<[1], [0], [0], [1], [0, 0, 1, 1], [], []>} : vector<8x128xf32>, vector<128x128xf32>, vector<8x128xf32> -> vector<8x128xf32>
    %18 = vector.broadcast %11 : vector<1x128xf32> to vector<8x128xf32>
    %19 = arith.addf %17, %18 : vector<8x128xf32>
    %20 = arith.addf %19, %3 : vector<8x128xf32>
    %cst_13 = arith.constant 0.000000e+00 : f32
    %21 = vector.broadcast %cst_13 : f32 to vector<8x128xf32>
    %22 = arith.maximumf %20, %21 : vector<8x128xf32>
    %c1 = arith.constant 1 : index
    %c0_14 = arith.constant 0 : index
    %c0_15 = arith.constant 0 : index
    %23 = vector.load %arg4[%c1, %c0_14, %c0_15] : memref<3x272x128xf32, #tpu.memory_space<vmem>>, vector<1x128x128xf32>
    %24 = vector.shape_cast %23 : vector<1x128x128xf32> to vector<128x128xf32>
    %c1_16 = arith.constant 1 : index
    %c128_17 = arith.constant 128 : index
    %c0_18 = arith.constant 0 : index
    %25 = vector.load %arg4[%c1_16, %c128_17, %c0_18] : memref<3x272x128xf32, #tpu.memory_space<vmem>>, vector<1x128x128xf32>
    %26 = vector.shape_cast %25 : vector<1x128x128xf32> to vector<128x128xf32>
    %c1_19 = arith.constant 1 : index
    %c256_20 = arith.constant 256 : index
    %c0_21 = arith.constant 0 : index
    %27 = vector.load %arg4[%c1_19, %c256_20, %c0_21] : memref<3x272x128xf32, #tpu.memory_space<vmem>>, vector<1x1x128xf32>
    %28 = vector.shape_cast %27 : vector<1x1x128xf32> to vector<1x128xf32>
    %c1_22 = arith.constant 1 : index
    %c264_23 = arith.constant 264 : index
    %c0_24 = arith.constant 0 : index
    %29 = vector.load %arg4[%c1_22, %c264_23, %c0_24] : memref<3x272x128xf32, #tpu.memory_space<vmem>>, vector<1x1x128xf32>
    %30 = vector.shape_cast %29 : vector<1x1x128xf32> to vector<1x128xf32>
    %cst_25 = arith.constant dense<0.000000e+00> : vector<8x128xf32>
    %31 = tpu.matmul %22, %24, %cst_25 {dimension_numbers = #tpu.dot_dimension_numbers<[1], [0], [0], [1], [0, 0, 1, 1], [], []>} : vector<8x128xf32>, vector<128x128xf32>, vector<8x128xf32> -> vector<8x128xf32>
    %32 = vector.broadcast %28 : vector<1x128xf32> to vector<8x128xf32>
    %33 = arith.addf %31, %32 : vector<8x128xf32>
    %cst_26 = arith.constant 0.000000e+00 : f32
    %34 = vector.broadcast %cst_26 : f32 to vector<8x128xf32>
    %35 = arith.maximumf %33, %34 : vector<8x128xf32>
    %cst_27 = arith.constant dense<0.000000e+00> : vector<8x128xf32>
    %36 = tpu.matmul %35, %26, %cst_27 {dimension_numbers = #tpu.dot_dimension_numbers<[1], [0], [0], [1], [0, 0, 1, 1], [], []>} : vector<8x128xf32>, vector<128x128xf32>, vector<8x128xf32> -> vector<8x128xf32>
    %37 = vector.broadcast %30 : vector<1x128xf32> to vector<8x128xf32>
    %38 = arith.addf %36, %37 : vector<8x128xf32>
    %39 = arith.addf %38, %22 : vector<8x128xf32>
    %cst_28 = arith.constant 0.000000e+00 : f32
    %40 = vector.broadcast %cst_28 : f32 to vector<8x128xf32>
    %41 = arith.maximumf %39, %40 : vector<8x128xf32>
    %c2 = arith.constant 2 : index
    %c0_29 = arith.constant 0 : index
    %c0_30 = arith.constant 0 : index
    %42 = vector.load %arg4[%c2, %c0_29, %c0_30] : memref<3x272x128xf32, #tpu.memory_space<vmem>>, vector<1x128x128xf32>
    %43 = vector.shape_cast %42 : vector<1x128x128xf32> to vector<128x128xf32>
    %c2_31 = arith.constant 2 : index
    %c128_32 = arith.constant 128 : index
    %c0_33 = arith.constant 0 : index
    %44 = vector.load %arg4[%c2_31, %c128_32, %c0_33] : memref<3x272x128xf32, #tpu.memory_space<vmem>>, vector<1x128x128xf32>
    %45 = vector.shape_cast %44 : vector<1x128x128xf32> to vector<128x128xf32>
    %c2_34 = arith.constant 2 : index
    %c256_35 = arith.constant 256 : index
    %c0_36 = arith.constant 0 : index
    %46 = vector.load %arg4[%c2_34, %c256_35, %c0_36] : memref<3x272x128xf32, #tpu.memory_space<vmem>>, vector<1x1x128xf32>
    %47 = vector.shape_cast %46 : vector<1x1x128xf32> to vector<1x128xf32>
    %c2_37 = arith.constant 2 : index
    %c264_38 = arith.constant 264 : index
    %c0_39 = arith.constant 0 : index
    %48 = vector.load %arg4[%c2_37, %c264_38, %c0_39] : memref<3x272x128xf32, #tpu.memory_space<vmem>>, vector<1x1x128xf32>
    %49 = vector.shape_cast %48 : vector<1x1x128xf32> to vector<1x128xf32>
    %cst_40 = arith.constant dense<0.000000e+00> : vector<8x128xf32>
    %50 = tpu.matmul %41, %43, %cst_40 {dimension_numbers = #tpu.dot_dimension_numbers<[1], [0], [0], [1], [0, 0, 1, 1], [], []>} : vector<8x128xf32>, vector<128x128xf32>, vector<8x128xf32> -> vector<8x128xf32>
    %51 = vector.broadcast %47 : vector<1x128xf32> to vector<8x128xf32>
    %52 = arith.addf %50, %51 : vector<8x128xf32>
    %cst_41 = arith.constant 0.000000e+00 : f32
    %53 = vector.broadcast %cst_41 : f32 to vector<8x128xf32>
    %54 = arith.maximumf %52, %53 : vector<8x128xf32>
    %cst_42 = arith.constant dense<0.000000e+00> : vector<8x128xf32>
    %55 = tpu.matmul %54, %45, %cst_42 {dimension_numbers = #tpu.dot_dimension_numbers<[1], [0], [0], [1], [0, 0, 1, 1], [], []>} : vector<8x128xf32>, vector<128x128xf32>, vector<8x128xf32> -> vector<8x128xf32>
    %56 = vector.broadcast %49 : vector<1x128xf32> to vector<8x128xf32>
    %57 = arith.addf %55, %56 : vector<8x128xf32>
    %58 = arith.addf %57, %41 : vector<8x128xf32>
    %cst_43 = arith.constant 0.000000e+00 : f32
    %59 = vector.broadcast %cst_43 : f32 to vector<8x128xf32>
    %60 = arith.maximumf %58, %59 : vector<8x128xf32>
    %c0_44 = arith.constant 0 : index
    %c0_45 = arith.constant 0 : index
    %61 = vector.load %arg8[%c0_44, %c0_45] : memref<8x128xf32, #tpu.memory_space<vmem>>, vector<8x128xf32>
    tpu.vector_store %arg8[%c0_44, %c0_45], %60 {strides = array<i32>} : memref<8x128xf32, #tpu.memory_space<vmem>>, vector<8x128xf32>,
    %c0_i32_46 = arith.constant 0 : i32
    %62 = arith.cmpi eq, %arg0, %c0_i32_46 : i32
    %63 = arith.extui %62 : i1 to i32
    %c0_i32_47 = arith.constant 0 : i32
    %64 = arith.cmpi ne, %63, %c0_i32_47 : i32
    scf.if %64 {
      %c0_48 = arith.constant 0 : index
      %c0_49 = arith.constant 0 : index
      %65 = vector.load %arg5[%c0_48, %c0_49] : memref<128x128xf32, #tpu.memory_space<vmem>>, vector<128x128xf32>
      %cst_50 = arith.constant dense<0.000000e+00> : vector<8x128xf32>
      %66 = tpu.matmul %60, %65, %cst_50 {dimension_numbers = #tpu.dot_dimension_numbers<[1], [0], [0], [1], [0, 0, 1, 1], [], []>} : vector<8x128xf32>, vector<128x128xf32>, vector<8x128xf32> -> vector<8x128xf32>
      %c0_51 = arith.constant 0 : index
      %c0_52 = arith.constant 0 : index
      %67 = vector.load %arg6[%c0_51, %c0_52] : memref<1x128xf32, #tpu.memory_space<vmem>>, vector<1x128xf32>
      %68 = vector.broadcast %67 : vector<1x128xf32> to vector<8x128xf32>
      %69 = arith.addf %66, %68 : vector<8x128xf32>
      %c0_53 = arith.constant 0 : index
      %c0_54 = arith.constant 0 : index
      %70 = vector.load %arg7[%c0_53, %c0_54] : memref<8x128xf32, #tpu.memory_space<vmem>>, vector<8x128xf32>
      tpu.vector_store %arg7[%c0_53, %c0_54], %69 {strides = array<i32>} : memref<8x128xf32, #tpu.memory_space<vmem>>, vector<8x128xf32>,
    } else {
    }
    return
  }
  func.func @transform_0(%arg0: i32) -> (i32, i32) {
    %c0_i32 = arith.constant 0 : i32
    %c0_i32_0 = arith.constant 0 : i32
    %c0_i32_1 = arith.constant 0 : i32
    return %c0_i32, %c0_i32_0 : i32, i32
  }
  func.func @transform_1(%arg0: i32) -> (i32, i32) {
    %c0_i32 = arith.constant 0 : i32
    %c0_i32_0 = arith.constant 0 : i32
    %c0_i32_1 = arith.constant 0 : i32
    return %c0_i32, %c0_i32_0 : i32, i32
  }
  func.func @transform_2(%arg0: i32) -> (i32, i32) {
    %c0_i32 = arith.constant 0 : i32
    %c0_i32_0 = arith.constant 0 : i32
    %c0_i32_1 = arith.constant 0 : i32
    return %c0_i32, %c0_i32_0 : i32, i32
  }
  func.func @transform_3(%arg0: i32) -> (i32, i32, i32) {
    %c0_i32 = arith.constant 0 : i32
    %c0_i32_0 = arith.constant 0 : i32
    %c0_i32_1 = arith.constant 0 : i32
    return %arg0, %c0_i32, %c0_i32_0 : i32, i32, i32
  }
  func.func @transform_4(%arg0: i32) -> (i32, i32) {
    %c0_i32 = arith.constant 0 : i32
    %c0_i32_0 = arith.constant 0 : i32
    %c0_i32_1 = arith.constant 0 : i32
    return %c0_i32, %c0_i32_0 : i32, i32
  }
  func.func @transform_5(%arg0: i32) -> (i32, i32) {
    %c0_i32 = arith.constant 0 : i32
    %c0_i32_0 = arith.constant 0 : i32
    %c0_i32_1 = arith.constant 0 : i32
    return %c0_i32, %c0_i32_0 : i32, i32
  }
  func.func @transform_6(%arg0: i32) -> (i32, i32) {
    %c0_i32 = arith.constant 0 : i32
    %c0_i32_0 = arith.constant 0 : i32
    %c0_i32_1 = arith.constant 0 : i32
    return %c0_i32, %c0_i32_0 : i32, i32
  }
}

</mosaic_0001>

<bundles_post_ra>
// kernel: tpu_custom_call.1
= control target key start
LH: loop header
LB: loop body
LE: loop exit
PB: predicated region body
PF: predicated region fallthrough
CT: control target
= control target key end

     0   :  { %11 = vsyncpa [#allocation4], 0  ;;  %s2148_s0 = inlined_call_operand.hbm [shape: f32[8,768], index: 0, kind: input, shape index: {}]   ;;  %s2149_s1 = inlined_call_operand.hbm [shape: f32[768,128], index: 1, kind: input, shape index: {}]   ;;  %s2150_s2 = inlined_call_operand.vmem [shape: f32[1,128], index: 2, kind: input, shape index: {}]   ;;  %s2151_s3 = inlined_call_operand.hbm [shape: f32[3,272,128], index: 3, kind: input, shape index: {}]   ;;  %s2152_s4 = inlined_call_operand.hbm [shape: f32[128,128], index: 4, kind: input, shape index: {}]   ;;  %s2153_s5 = inlined_call_operand.vmem [shape: f32[1,128], index: 5, kind: input, shape index: {}]   ;;  %s2154_s6 = inlined_call_operand.hbm [shape: f32[8,128], index: 6, kind: output, shape index: {}]  }
   0x1   :  { %12 = vsyncpa [#allocation7], 0 }
   0x2   :  { %13 = vsyncpa [#allocation10], 0 }
   0x3   :  { %14 = vsyncpa [#allocation5], 0  ;;  %s1944_s21 = smov [#allocation6]   ;;  %s1826_s25 = scalar_lea.hbm %s2149_s1, 12288 }
   0x4   :  { %s30_s22 = sshll.u32 %s1944_s21, 4  ;;  %p1827_p0 = scmp.ne.s32.totalorder %s2149_s1, %s1826_s25  ;;  %s31_s22 = int_to_ptr.vmem [resolvable:$true] %s30_s22 }
   0x5   :  { %p1830_p1 = scmp.lt.u32.totalorder %s1826_s25, %s2149_s1 }
   0x7   :  { %p1832_p2 = pnand %p1830_p1, %p1827_p0 }
   0x9   :  { %1835 = shalt.err (!%p1832_p2)
}
   0xa   :  { %s1836_s30 = scalar_lea.vmem %s31_s22, 12288  ;;  %p1841_p4 = scmp.lt.s32.totalorder %s31_s22, %s31_s22 }
   0xb   :  { %p1837_p3 = scmp.ne.s32.totalorder %s31_s22, %s1836_s30  ;;  %p1842_p5 = scmp.lt.s32.totalorder %s1836_s30, %s1836_s30 }
   0xd   :  { %p1843_p6 = por %p1842_p5, %p1841_p4 }
   0xf   :  { %p1844_p7 = pnand %p1843_p6, %p1837_p3 }
  0x11   :  { %1847 = shalt.err (!%p1844_p7)
}
  0x12   :  { %s1945_s7 = smov 128   ;;  %s1946_s8 = smov 8  }
  0x13   :  { %36 = dma.hbm_to_vmem [thread:$0]  %s2149_s1, 12288, %s31_s22, [#allocation7], %s1945_s7, %s1945_s7, %s1946_s8  }
  0x14   :  { %s1947_s11 = smov [#allocation3]   ;;  %s1948_s13 = smov [#allocation8]  }
  0x15   :  { %s21_s12 = sshll.u32 %s1947_s11, 4  ;;  %s44_s14 = sshll.u32 %s1948_s13, 4  ;;  %s22_s12 = int_to_ptr.vmem [resolvable:$true] %s21_s12  ;;  %s45_s14 = int_to_ptr.vmem [resolvable:$true] %s44_s14 }
  0x16   :  { %s1848_s17 = scalar_lea.hbm %s2148_s0, 768 }
  0x17   :  { %p1849_p8 = scmp.ne.s32.totalorder %s2148_s0, %s1848_s17  ;;  %p1852_p9 = scmp.lt.u32.totalorder %s1848_s17, %s2148_s0 }
  0x19   :  { %p1854_p10 = pnand %p1852_p9, %p1849_p8 }
  0x1b   :  { %1857 = shalt.err (!%p1854_p10)
}
  0x1c   :  { %s1858_s1 = scalar_lea.vmem %s22_s12, 768  ;;  %p1863_p12 = scmp.lt.s32.totalorder %s22_s12, %s22_s12 }
  0x1d   :  { %p1859_p11 = scmp.ne.s32.totalorder %s22_s12, %s1858_s1  ;;  %p1864_p13 = scmp.lt.s32.totalorder %s1858_s1, %s1858_s1 }
  0x1f   :  { %p1865_p0 = por %p1864_p13, %p1863_p12 }
  0x21   :  { %p1866_p1 = pnand %p1865_p0, %p1859_p11 }
  0x23   :  { %1869 = shalt.err (!%p1866_p1)
}
  0x24   :  { %24 = dma.hbm_to_vmem [thread:$0]  %s2148_s0, 768, %s22_s12, [#allocation4]  }
  0x25   :  { %s1870_s26 = scalar_lea.hbm %s2151_s3, 13056 }
  0x26   :  { %p1871_p2 = scmp.ne.s32.totalorder %s2151_s3, %s1870_s26  ;;  %p1874_p3 = scmp.lt.u32.totalorder %s1870_s26, %s2151_s3 }
  0x28   :  { %p1876_p4 = pnand %p1874_p3, %p1871_p2 }
  0x2a   :  { %1879 = shalt.err (!%p1876_p4)
}
  0x2b   :  { %s1880_s9 = scalar_lea.vmem %s45_s14, 13056  ;;  %p1885_p6 = scmp.lt.s32.totalorder %s45_s14, %s45_s14 }
  0x2c   :  { %p1881_p5 = scmp.ne.s32.totalorder %s45_s14, %s1880_s9  ;;  %p1886_p7 = scmp.lt.s32.totalorder %s1880_s9, %s1880_s9 }
  0x2e   :  { %p1887_p8 = por %p1886_p7, %p1885_p6 }
  0x30   :  { %p1888_p9 = pnand %p1887_p8, %p1881_p5 }
  0x32   :  { %1891 = shalt.err (!%p1888_p9)
}
  0x33   :  { %50 = dma.hbm_to_vmem [thread:$0]  %s2151_s3, 13056, %s45_s14, [#allocation7], %s1945_s7, %s1945_s7, %s1946_s8  }
  0x34   :  { %s1949_s11 = smov [#allocation9]   ;;  %s1892_s16 = scalar_lea.hbm %s2152_s4, 2048 }
  0x35   :  { %s56_s12 = sshll.u32 %s1949_s11, 4  ;;  %p1893_p10 = scmp.ne.s32.totalorder %s2152_s4, %s1892_s16  ;;  %s57_s12 = int_to_ptr.vmem [resolvable:$true] %s56_s12 }
  0x36   :  { %p1896_p11 = scmp.lt.u32.totalorder %s1892_s16, %s2152_s4 }
  0x38   :  { %p1898_p12 = pnand %p1896_p11, %p1893_p10 }
  0x3a   :  { %1901 = shalt.err (!%p1898_p12)
}
  0x3b   :  { %s1902_s21 = scalar_lea.vmem %s57_s12, 2048  ;;  %p1907_p0 = scmp.lt.s32.totalorder %s57_s12, %s57_s12 }
  0x3c   :  { %p1903_p13 = scmp.ne.s32.totalorder %s57_s12, %s1902_s21  ;;  %p1908_p1 = scmp.lt.s32.totalorder %s1902_s21, %s1902_s21 }
  0x3e   :  { %p1909_p2 = por %p1908_p1, %p1907_p0 }
  0x40   :  { %p1910_p3 = pnand %p1909_p2, %p1903_p13 }
  0x42   :  { %1913 = shalt.err (!%p1910_p3)
}
  0x43   :  { %62 = dma.hbm_to_vmem [thread:$0]  %s2152_s4, 2048, %s57_s12, [#allocation10], %s1945_s7, %s1945_s7, %s1946_s8  }
  0x44   :  { %1936 = dma.done.wait [#allocation4], 768  }
  0x45   :  { %1937 = vsyncadd [#allocation4], 4294966528 }
  0x46   :  { %1938 = dma.done.wait [#allocation7], 25344  }
  0x47   :  { %1939 = vsyncadd [#allocation7], 4294941952 }
  0x48   :  { %1940 = dma.done.wait [#allocation10], 2048  }
  0x49   :  { %1941 = vsyncadd [#allocation10], 4294965248  ;;  %v103_v0 = vld [vmem:[#allocation6 + $0x80] sm:$0xff]  ;;  %v104_v1 = vld [vmem:[#allocation6 + $0x88] sm:$0xff]  ;;  %vm1951_vm0 = vmmov 0   ;;  %s1953_s1 = smov [#allocation11]  }
  0x4a   :  { %v87_v2 = vld [vmem:[#allocation6] sm:$0xff]  ;;  %v1552_v3 = vpack.c.bf16 %v104_v1, %v103_v0  ;;  %v88_v4 = vld [vmem:[#allocation6 + $0x8] sm:$0xff]  ;;  %v105_v11 = vld [vmem:[#allocation6 + $0x90] sm:$0xff]  ;;  %s1064_s22 = sshll.u32 %s1953_s1, 4  ;;  %s1065_s22 = int_to_ptr.vmem [resolvable:$true] %s1064_s22 }
  0x4b   :  { %v135_v5 = vld [vmem:[#allocation6 + $0x180] sm:$0xff]  ;;  %v136_v6 = vld [vmem:[#allocation6 + $0x188] sm:$0xff]  ;;  %v1554_v7 = vpack.c.bf16 %v88_v4, %v87_v2  ;;  %v106_v13 = vld [vmem:[#allocation6 + $0x98] sm:$0xff]  ;;  %s1914_s23 = scalar_lea.vmem %s1065_s22, 128  ;;  %p1919_p5 = scmp.lt.s32.totalorder %s1065_s22, %s1065_s22 }
  0x4c   :  { %v1584_v8 = vpack.c.bf16 %v136_v6, %v135_v5  ;;  %v119_v9 = vld [vmem:[#allocation6 + $0x100] sm:$0xff]  ;;  %v120_v10 = vld [vmem:[#allocation6 + $0x108] sm:$0xff]  ;;  %1553 = vmatprep.subr.bf16.mxu0 %v1552_v3  ;;  %v89_v14 = vld [vmem:[#allocation6 + $0x10] sm:$0xff]  ;;  %v1556_v16 = vpack.c.bf16 %v106_v13, %v105_v11  ;;  %p1915_p4 = scmp.ne.s32.totalorder %s1065_s22, %s1914_s23  ;;  %p1920_p6 = scmp.lt.s32.totalorder %s1914_s23, %s1914_s23 }
  0x4d   :  { %v1586_v12 = vpack.c.bf16 %v120_v10, %v119_v9  ;;  %v90_v15 = vld [vmem:[#allocation6 + $0x18] sm:$0xff]  ;;  %1555 = vmatpush3.bf16.msra.mxu0 %v1554_v7  ;;  %v137_v18 = vld [vmem:[#allocation6 + $0x190] sm:$0xff]  ;;  %v107_v23 = vld [vmem:[#allocation6 + $0xa0] sm:$0xff] }
  0x4e   :  { %1585 = vmatprep.subr.bf16.mxu1 %v1584_v8  ;;  %v1558_v17 = vpack.c.bf16 %v90_v15, %v89_v14  ;;  %v138_v19 = vld [vmem:[#allocation6 + $0x198] sm:$0xff]  ;;  %v121_v20 = vld [vmem:[#allocation6 + $0x110] sm:$0xff]  ;;  %v108_v24 = vld [vmem:[#allocation6 + $0xa8] sm:$0xff]  ;;  %1557 = vmatprep.subr.bf16.mxu0 %v1556_v16  ;;  %p1921_p7 = por %p1920_p6, %p1919_p5 }
  0x4f   :  { %1587 = vmatpush3.bf16.msra.mxu1 %v1586_v12  ;;  %v1588_v21 = vpack.c.bf16 %v138_v19, %v137_v18  ;;  %v122_v22 = vld [vmem:[#allocation6 + $0x118] sm:$0xff]  ;;  %v1560_v26 = vpack.c.bf16 %v108_v24, %v107_v23  ;;  %v91_v27 = vld [vmem:[#allocation6 + $0x20] sm:$0xff]  ;;  %v92_v28 = vld [vmem:[#allocation6 + $0x28] sm:$0xff] }
  0x50   :  { %v1590_v25 = vpack.c.bf16 %v122_v22, %v121_v20  ;;  %v139_v29 = vld [vmem:[#allocation6 + $0x1a0] sm:$0xff]  ;;  %v140_v30 = vld [vmem:[#allocation6 + $0x1a8] sm:$0xff]  ;;  %v1562_v33 = vpack.c.bf16 %v92_v28, %v91_v27  ;;  %v109_v35 = vld [vmem:[#allocation6 + $0xb0] sm:$0xff]  ;;  %p1922_p8 = pnand %p1921_p7, %p1915_p4 }
  0x51   :  { %1589 = vmatprep.subr.bf16.mxu1 %v1588_v21  ;;  %v123_v31 = vld [vmem:[#allocation6 + $0x120] sm:$0xff]  ;;  %v124_v32 = vld [vmem:[#allocation6 + $0x128] sm:$0xff]  ;;  %1559 = vmatpush3.bf16.msra.mxu0 %v1558_v17  ;;  %v1592_v34 = vpack.c.bf16 %v140_v30, %v139_v29  ;;  %v110_v36 = vld [vmem:[#allocation6 + $0xb8] sm:$0xff] }
  0x52   :  { %v93_v37 = vld [vmem:[#allocation6 + $0x30] sm:$0xff]  ;;  %1561 = vmatprep.subr.bf16.mxu0 %v1560_v26  ;;  %v1594_v38 = vpack.c.bf16 %v124_v32, %v123_v31  ;;  %v1564_v39 = vpack.c.bf16 %v110_v36, %v109_v35  ;;  %v94_v40 = vld [vmem:[#allocation6 + $0x38] sm:$0xff]  ;;  %v111_v46 = vld [vmem:[#allocation6 + $0xc0] sm:$0xff] }
  0x53   :  { %1591 = vmatpush3.bf16.msra.mxu1 %v1590_v25  ;;  %v141_v41 = vld [vmem:[#allocation6 + $0x1b0] sm:$0xff]  ;;  %v142_v42 = vld [vmem:[#allocation6 + $0x1b8] sm:$0xff]  ;;  %v112_v47 = vld [vmem:[#allocation6 + $0xc8] sm:$0xff]  ;;  %v1566_v48 = vpack.c.bf16 %v94_v40, %v93_v37 }
  0x54   :  { %1593 = vmatprep.subr.bf16.mxu1 %v1592_v34  ;;  %v1596_v43 = vpack.c.bf16 %v142_v42, %v141_v41  ;;  %v125_v44 = vld [vmem:[#allocation6 + $0x130] sm:$0xff]  ;;  %v126_v45 = vld [vmem:[#allocation6 + $0x138] sm:$0xff]  ;;  %v143_v49 = vld [vmem:[#allocation6 + $0x1c0] sm:$0xff]  ;;  %v1568_v52 = vpack.c.bf16 %v112_v47, %v111_v46 }
  0x55   :  { %1563 = vmatpush3.bf16.msra.mxu0 %v1562_v33  ;;  %v144_v50 = vld [vmem:[#allocation6 + $0x1c8] sm:$0xff]  ;;  %v1598_v51 = vpack.c.bf16 %v126_v45, %v125_v44  ;;  %v95_v53 = vld [vmem:[#allocation6 + $0x40] sm:$0xff]  ;;  %v113_v58 = vld [vmem:[#allocation6 + $0xd0] sm:$0xff] }
  0x56   :  { %1565 = vmatprep.subr.bf16.mxu0 %v1564_v39  ;;  %v96_v54 = vld [vmem:[#allocation6 + $0x48] sm:$0xff]  ;;  %v127_v55 = vld [vmem:[#allocation6 + $0x140] sm:$0xff]  ;;  %v1600_v56 = vpack.c.bf16 %v144_v50, %v143_v49  ;;  %v114_v59 = vld [vmem:[#allocation6 + $0xd8] sm:$0xff] }
  0x57   :  { %1595 = vmatpush3.bf16.msra.mxu1 %v1594_v38  ;;  %v128_v57 = vld [vmem:[#allocation6 + $0x148] sm:$0xff]  ;;  %v145_v60 = vld [vmem:[#allocation6 + $0x1d0] sm:$0xff]  ;;  %v146_v61 = vld [vmem:[#allocation6 + $0x1d8] sm:$0xff]  ;;  %v1570_v62 = vpack.c.bf16 %v96_v54, %v95_v53  ;;  %v1572_v0 = vpack.c.bf16 %v114_v59, %v113_v58 }
  0x58   :  { %1597 = vmatprep.subr.bf16.mxu1 %v1596_v43  ;;  %v1602_v63 = vpack.c.bf16 %v128_v57, %v127_v55  ;;  %v97_v1 = vld [vmem:[#allocation6 + $0x50] sm:$0xff]  ;;  %v98_v2 = vld [vmem:[#allocation6 + $0x58] sm:$0xff]  ;;  %v1604_v4 = vpack.c.bf16 %v146_v61, %v145_v60  ;;  %v115_v6 = vld [vmem:[#allocation6 + $0xe0] sm:$0xff] }
  0x59   :  { %1567 = vmatpush3.bf16.msra.mxu0 %v1566_v48  ;;  %v129_v3 = vld [vmem:[#allocation6 + $0x150] sm:$0xff]  ;;  %v130_v5 = vld [vmem:[#allocation6 + $0x158] sm:$0xff]  ;;  %v116_v7 = vld [vmem:[#allocation6 + $0xe8] sm:$0xff]  ;;  %v1574_v10 = vpack.c.bf16 %v98_v2, %v97_v1 }
  0x5a   :  { %1569 = vmatprep.subr.bf16.mxu0 %v1568_v52  ;;  %v147_v8 = vld [vmem:[#allocation6 + $0x1e0] sm:$0xff]  ;;  %v148_v9 = vld [vmem:[#allocation6 + $0x1e8] sm:$0xff]  ;;  %v82_v12 = vld [vmem:[#allocation3 + $0x8] sm:$0xff]  ;;  %v1606_v13 = vpack.c.bf16 %v130_v5, %v129_v3  ;;  %v1576_v14 = vpack.c.bf16 %v116_v7, %v115_v6 }
  0x5b   :  { %1599 = vmatpush3.bf16.msra.mxu1 %v1598_v51  ;;  %v99_v11 = vld [vmem:[#allocation6 + $0x60] sm:$0xff]  ;;  %v100_v15 = vld [vmem:[#allocation6 + $0x68] sm:$0xff]  ;;  %v1608_v18 = vpack.c.bf16 %v148_v9, %v147_v8  ;;  %v117_v19 = vld [vmem:[#allocation6 + $0xf0] sm:$0xff]  ;;  %254 = vmatprep.mubr.f32.mxu0 %v82_v12 }
  0x5c   :  { %1601 = vmatprep.subr.bf16.mxu1 %v1600_v56  ;;  %v131_v16 = vld [vmem:[#allocation6 + $0x160] sm:$0xff]  ;;  %v132_v17 = vld [vmem:[#allocation6 + $0x168] sm:$0xff]  ;;  %v118_v20 = vld [vmem:[#allocation6 + $0xf8] sm:$0xff]  ;;  %v1578_v24 = vpack.c.bf16 %v100_v15, %v99_v11 }
  0x5d   :  { %1571 = vmatpush3.bf16.msra.mxu0 %v1570_v62  ;;  %v84_v21 = vld [vmem:[#allocation3 + $0x18] sm:$0xff]  ;;  %v149_v22 = vld [vmem:[#allocation6 + $0x1f0] sm:$0xff]  ;;  %v150_v23 = vld [vmem:[#allocation6 + $0x1f8] sm:$0xff]  ;;  %v1610_v25 = vpack.c.bf16 %v132_v17, %v131_v16  ;;  %v1580_v26 = vpack.c.bf16 %v118_v20, %v117_v19 }
  0x5e   :  { %1573 = vmatprep.subr.bf16.mxu0 %v1572_v0  ;;  %324 = vmatprep.mubr.f32.mxu1 %v84_v21  ;;  %v101_v27 = vld [vmem:[#allocation6 + $0x70] sm:$0xff]  ;;  %v102_v28 = vld [vmem:[#allocation6 + $0x78] sm:$0xff]  ;;  %v1612_v30 = vpack.c.bf16 %v150_v23, %v149_v22  ;;  %v167_v32 = vld [vmem:[#allocation6 + $0x280] sm:$0xff] }
  0x5f   :  { %1603 = vmatpush3.bf16.msra.mxu1 %v1602_v63  ;;  %v133_v29 = vld [vmem:[#allocation6 + $0x170] sm:$0xff]  ;;  %v134_v31 = vld [vmem:[#allocation6 + $0x178] sm:$0xff]  ;;  %v168_v33 = vld [vmem:[#allocation6 + $0x288] sm:$0xff]  ;;  %v1582_v34 = vpack.c.bf16 %v102_v28, %v101_v27 }
  0x60   :  { %1605 = vmatprep.subr.bf16.mxu1 %v1604_v4  ;;  %v1614_v35 = vpack.c.bf16 %v134_v31, %v133_v29  ;;  %v1616_v36 = vpack.c.bf16 %v168_v33, %v167_v32  ;;  %v151_v37 = vld [vmem:[#allocation6 + $0x200] sm:$0xff]  ;;  %v152_v38 = vld [vmem:[#allocation6 + $0x208] sm:$0xff]  ;;  %v169_v39 = vld [vmem:[#allocation6 + $0x290] sm:$0xff] }
  0x61   :  { %1575 = vmatpush3.bf16.msra.mxu0 %v1574_v10  ;;  %v170_v40 = vld [vmem:[#allocation6 + $0x298] sm:$0xff]  ;;  %v81_v41 = vld [vmem:[#allocation3] sm:$0xff]  ;;  %v1618_v42 = vpack.c.bf16 %v152_v38, %v151_v37  ;;  %v83_v43 = vld [vmem:[#allocation3 + $0x10] sm:$0xff] }
  0x62   :  { %1577 = vmatprep.subr.bf16.mxu0 %v1576_v14  ;;  %v1620_v44 = vpack.c.bf16 %v170_v40, %v169_v39  ;;  %v153_v45 = vld [vmem:[#allocation6 + $0x210] sm:$0xff]  ;;  %v154_v46 = vld [vmem:[#allocation6 + $0x218] sm:$0xff]  ;;  %v171_v47 = vld [vmem:[#allocation6 + $0x2a0] sm:$0xff] }
  0x63   :  { %1607 = vmatpush3.bf16.msra.mxu1 %v1606_v13  ;;  %v172_v48 = vld [vmem:[#allocation6 + $0x2a8] sm:$0xff]  ;;  %v86_v49 = vld [vmem:[#allocation3 + $0x28] sm:$0xff]  ;;  %v1622_v50 = vpack.c.bf16 %v154_v46, %v153_v45  ;;  %v155_v52 = vld [vmem:[#allocation6 + $0x220] sm:$0xff] }
  0x64   :  { %1609 = vmatprep.subr.bf16.mxu1 %v1608_v18  ;;  %v1624_v51 = vpack.c.bf16 %v172_v48, %v171_v47  ;;  %v156_v53 = vld [vmem:[#allocation6 + $0x228] sm:$0xff]  ;;  %v173_v54 = vld [vmem:[#allocation6 + $0x2b0] sm:$0xff]  ;;  %v174_v55 = vld [vmem:[#allocation6 + $0x2b8] sm:$0xff]  ;;  %v1952_v47 = vmov 0.0  }
  0x65   :  { %1579 = vmatpush3.bf16.msra.mxu0 %v1578_v24  ;;  %v1626_v56 = vpack.c.bf16 %v156_v53, %v155_v52  ;;  %v1628_v57 = vpack.c.bf16 %v174_v55, %v173_v54  ;;  %v157_v58 = vld [vmem:[#allocation6 + $0x230] sm:$0xff]  ;;  %v158_v59 = vld [vmem:[#allocation6 + $0x238] sm:$0xff]  ;;  %v175_v60 = vld [vmem:[#allocation6 + $0x2c0] sm:$0xff] }
  0x66   :  { %1581 = vmatprep.subr.bf16.mxu0 %v1580_v26  ;;  %v176_v61 = vld [vmem:[#allocation6 + $0x2c8] sm:$0xff]  ;;  %v1630_v62 = vpack.c.bf16 %v158_v59, %v157_v58  ;;  %v159_v0 = vld [vmem:[#allocation6 + $0x240] sm:$0xff]  ;;  %v177_v2 = vld [vmem:[#allocation6 + $0x2d0] sm:$0xff] }
  0x67   :  { %1611 = vmatpush3.bf16.msra.mxu1 %v1610_v25  ;;  %v1632_v63 = vpack.c.bf16 %v176_v61, %v175_v60  ;;  %v160_v1 = vld [vmem:[#allocation6 + $0x248] sm:$0xff]  ;;  %v178_v3 = vld [vmem:[#allocation6 + $0x2d8] sm:$0xff]  ;;  %v161_v6 = vld [vmem:[#allocation6 + $0x250] sm:$0xff]  ;;  %v1950_v25 = vmov 0.0|0.0  }
  0x68   :  { %1613 = vmatprep.subr.bf16.mxu1 %v1612_v30  ;;  %v1634_v4 = vpack.c.bf16 %v160_v1, %v159_v0  ;;  %v1636_v5 = vpack.c.bf16 %v178_v3, %v177_v2  ;;  %v162_v7 = vld [vmem:[#allocation6 + $0x258] sm:$0xff]  ;;  %v179_v8 = vld [vmem:[#allocation6 + $0x2e0] sm:$0xff]  ;;  %v180_v9 = vld [vmem:[#allocation6 + $0x2e8] sm:$0xff] }
  0x69   :  { %1583 = vmatpush3.bf16.msra.mxu0 %v1582_v34  ;;  %v1638_v10 = vpack.c.bf16 %v162_v7, %v161_v6  ;;  %v1640_v11 = vpack.c.bf16 %v180_v9, %v179_v8  ;;  %v163_v12 = vld [vmem:[#allocation6 + $0x260] sm:$0xff]  ;;  %v164_v13 = vld [vmem:[#allocation6 + $0x268] sm:$0xff]  ;;  %v181_v14 = vld [vmem:[#allocation6 + $0x2f0] sm:$0xff] }
  0x6a   :  { %1617 = vmatprep.subr.bf16.mxu0 %v1616_v36  ;;  %v182_v15 = vld [vmem:[#allocation6 + $0x2f8] sm:$0xff]  ;;  %v1642_v16 = vpack.c.bf16 %v164_v13, %v163_v12  ;;  %v165_v18 = vld [vmem:[#allocation6 + $0x270] sm:$0xff]  ;;  %v403_v22 = vld [vmem:[#allocation8] sm:$0xff] }
  0x6b   :  { %1615 = vmatpush3.bf16.msra.mxu1 %v1614_v35  ;;  %v1644_v17 = vpack.c.bf16 %v182_v15, %v181_v14  ;;  %v166_v19 = vld [vmem:[#allocation6 + $0x278] sm:$0xff]  ;;  %v85_v21 = vld [vmem:[#allocation3 + $0x20] sm:$0xff]  ;;  %v404_v23 = vld [vmem:[#allocation8 + $0x8] sm:$0xff] }
  0x6c   :  { %255 = vmatmul.mubr.f32.vlgmr.msra.gmra.mrb[0].mxu0 %v81_v41  ;;  %v1646_v20 = vpack.c.bf16 %v166_v19, %v165_v18  ;;  %v405_v24 = vld [vmem:[#allocation8 + $0x10] sm:$0xff]  ;;  %1648 = vmatprep.subr.bf16.mxu1 %v1950_v25  ;;  %v1649_v26 = vpack.c.bf16 %v404_v23, %v403_v22  ;;  %v406_v27 = vld [vmem:[#allocation8 + $0x18] sm:$0xff]  ;;  %v407_v29 = vld [vmem:[#allocation8 + $0x20] sm:$0xff] }
  0x6d   :  { %1619 = vmatpush3.bf16.msra.mxu0 %v1618_v42  ;;  %394 = vmatprep.mubr.f32.mxu0 %v86_v49  ;;  %v1652_v28 = vpack.c.bf16 %v406_v27, %v405_v24  ;;  %v408_v30 = vld [vmem:[#allocation8 + $0x28] sm:$0xff]  ;;  %v409_v32 = vld [vmem:[#allocation8 + $0x30] sm:$0xff]  ;;  %v410_v33 = vld [vmem:[#allocation8 + $0x38] sm:$0xff] }
  0x6e   :  { %325 = vmatmul.mubr.f32.vlgmr.msra.gmra.mrb[0].mxu1 %v83_v43  ;;  %1621 = vmatprep.subr.bf16.mxu0 %v1620_v44  ;;  %v1655_v31 = vpack.c.bf16 %v408_v30, %v407_v29  ;;  %v1658_v34 = vpack.c.bf16 %v410_v33, %v409_v32  ;;  %v411_v35 = vld [vmem:[#allocation8 + $0x40] sm:$0xff]  ;;  %v412_v36 = vld [vmem:[#allocation8 + $0x48] sm:$0xff]  ;;  %v413_v38 = vld [vmem:[#allocation8 + $0x50] sm:$0xff] }
  0x6f   :  { %1650 = vmatpush3.bf16.msra.mxu1 %v1649_v26  ;;  %v1661_v37 = vpack.c.bf16 %v412_v36, %v411_v35  ;;  %v414_v39 = vld [vmem:[#allocation8 + $0x58] sm:$0xff]  ;;  %v415_v41 = vld [vmem:[#allocation8 + $0x60] sm:$0xff]  ;;  %v416_v42 = vld [vmem:[#allocation8 + $0x68] sm:$0xff]  ;;  %1339 = vmatprep.mubr.msk.f32.mxu1 %vm1951_vm0, %v1952_v47 }
  0x70   :  { %1651 = vmatprep.subr.bf16.mxu1 %v1950_v25  ;;  %v1664_v40 = vpack.c.bf16 %v414_v39, %v413_v38  ;;  %v1667_v43 = vpack.c.bf16 %v416_v42, %v415_v41  ;;  %v417_v44 = vld [vmem:[#allocation8 + $0x70] sm:$0xff]  ;;  %v418_v45 = vld [vmem:[#allocation8 + $0x78] sm:$0xff]  ;;  %v419_v48 = vld [vmem:[#allocation8 + $0x80] sm:$0xff] }
  0x71   :  { %1623 = vmatpush3.bf16.msra.mxu0 %v1622_v50  ;;  %v1670_v46 = vpack.c.bf16 %v418_v45, %v417_v44  ;;  %v420_v49 = vld [vmem:[#allocation8 + $0x88] sm:$0xff]  ;;  %v421_v50 = vld [vmem:[#allocation8 + $0x90] sm:$0xff]  ;;  %v422_v52 = vld [vmem:[#allocation8 + $0x98] sm:$0xff] }
  0x72   :  { %1625 = vmatprep.subr.bf16.mxu0 %v1624_v51  ;;  %v1673_v51 = vpack.c.bf16 %v420_v49, %v419_v48  ;;  %v1676_v53 = vpack.c.bf16 %v422_v52, %v421_v50  ;;  %v423_v54 = vld [vmem:[#allocation8 + $0xa0] sm:$0xff]  ;;  %v424_v55 = vld [vmem:[#allocation8 + $0xa8] sm:$0xff]  ;;  %v426_v58 = vld [vmem:[#allocation8 + $0xb8] sm:$0xff] }
  0x73   :  { %1653 = vmatpush3.bf16.msra.mxu1 %v1652_v28  ;;  %v427_v60 = vld [vmem:[#allocation8 + $0xc0] sm:$0xff]  ;;  %v428_v61 = vld [vmem:[#allocation8 + $0xc8] sm:$0xff]  ;;  %v430_v0 = vld [vmem:[#allocation8 + $0xd8] sm:$0xff] }
  0x74   :  { %1654 = vmatprep.subr.bf16.mxu1 %v1950_v25  ;;  %v431_v2 = vld [vmem:[#allocation8 + $0xe0] sm:$0xff]  ;;  %v432_v3 = vld [vmem:[#allocation8 + $0xe8] sm:$0xff]  ;;  %v1075_v6 = vld [vmem:[%s2150_s2] ss:$0 sm:$0xff] }
  0x75   :  { %1627 = vmatpush3.bf16.msra.mxu0 %v1626_v56  ;;  %v1679_v56 = vpack.c.bf16 %v424_v55, %v423_v54  ;;  %v433_v19 = vld [vmem:[#allocation8 + $0xf0] sm:$0xff]  ;;  %v590_v23 = vld [vmem:[#allocation8 + $0x118] sm:$0xff]  ;;  %v591_v24 = vld [vmem:[#allocation8 + $0x120] sm:$0xff] }
  0x76   :  { %1629 = vmatprep.subr.bf16.mxu0 %v1628_v57  ;;  %v425_v57 = vld [vmem:[#allocation8 + $0xb0] sm:$0xff]  ;;  %v592_v27 = vld [vmem:[#allocation8 + $0x128] sm:$0xff]  ;;  %v594_v30 = vld [vmem:[#allocation8 + $0x138] sm:$0xff] }
  0x77   :  { %1656 = vmatpush3.bf16.msra.mxu1 %v1655_v31  ;;  %v1682_v59 = vpack.c.bf16 %v426_v58, %v425_v57  ;;  %v589_v22 = vld [vmem:[#allocation8 + $0x110] sm:$0xff]  ;;  %v1700_v28 = vpack.c.bf16 %v592_v27, %v591_v24  ;;  %v595_v32 = vld [vmem:[#allocation8 + $0x140] sm:$0xff]  ;;  %v596_v33 = vld [vmem:[#allocation8 + $0x148] sm:$0xff] }
  0x78   :  { %1657 = vmatprep.subr.bf16.mxu1 %v1950_v25  ;;  %v1697_v26 = vpack.c.bf16 %v590_v23, %v589_v22  ;;  %v593_v29 = vld [vmem:[#allocation8 + $0x130] sm:$0xff]  ;;  %v598_v36 = vld [vmem:[#allocation8 + $0x158] sm:$0xff]  ;;  %v599_v38 = vld [vmem:[#allocation8 + $0x160] sm:$0xff] }
  0x79   :  { %1631 = vmatpush3.bf16.msra.mxu0 %v1630_v62  ;;  %v1685_v62 = vpack.c.bf16 %v428_v61, %v427_v60  ;;  %v1703_v31 = vpack.c.bf16 %v594_v30, %v593_v29  ;;  %v597_v35 = vld [vmem:[#allocation8 + $0x150] sm:$0xff]  ;;  %v600_v39 = vld [vmem:[#allocation8 + $0x168] sm:$0xff]  ;;  %v1076_v41 = vld [vmem:[#allocation8 + $0x100] ss:$0 sm:$0xff] }
  0x7a   :  { %1633 = vmatprep.subr.bf16.mxu0 %v1632_v63  ;;  %v429_v63 = vld [vmem:[#allocation8 + $0xd0] sm:$0xff]  ;;  %v602_v48 = vld [vmem:[#allocation8 + $0x178] sm:$0xff]  ;;  %v603_v50 = vld [vmem:[#allocation8 + $0x180] sm:$0xff] }
  0x7b   :  { %1659 = vmatpush3.bf16.msra.mxu1 %v1658_v34  ;;  %v1688_v1 = vpack.c.bf16 %v430_v0, %v429_v63  ;;  %v1706_v34 = vpack.c.bf16 %v596_v33, %v595_v32  ;;  %v606_v54 = vld [vmem:[#allocation8 + $0x198] sm:$0xff]  ;;  %v607_v55 = vld [vmem:[#allocation8 + $0x1a0] sm:$0xff]  ;;  %v608_v57 = vld [vmem:[#allocation8 + $0x1a8] sm:$0xff] }
  0x7c   :  { %1660 = vmatprep.subr.bf16.mxu1 %v1950_v25  ;;  %v1724_v58 = vpack.c.bf16 %v608_v57, %v607_v55  ;;  %v610_v60 = vld [vmem:[#allocation8 + $0x1b8] sm:$0xff]  ;;  %v612_v63 = vld [vmem:[#allocation8 + $0x1c8] sm:$0xff]  ;;  %v777_v23 = vld [vmem:[#allocation8 + $0x230] sm:$0xff] }
  0x7d   :  { %1635 = vmatpush3.bf16.msra.mxu0 %v1634_v4  ;;  %v1691_v4 = vpack.c.bf16 %v432_v3, %v431_v2  ;;  %v614_v2 = vld [vmem:[#allocation8 + $0x1d8] sm:$0xff]  ;;  %v776_v22 = vld [vmem:[#allocation8 + $0x228] sm:$0xff]  ;;  %v781_v29 = vld [vmem:[#allocation8 + $0x250] sm:$0xff] }
  0x7e   :  { %1637 = vmatprep.subr.bf16.mxu0 %v1636_v5  ;;  %v780_v27 = vld [vmem:[#allocation8 + $0x248] sm:$0xff]  ;;  %v782_v30 = vld [vmem:[#allocation8 + $0x258] sm:$0xff]  ;;  %v783_v32 = vld [vmem:[#allocation8 + $0x260] sm:$0xff] }
  0x7f   :  { %1662 = vmatpush3.bf16.msra.mxu1 %v1661_v37  ;;  %v1709_v37 = vpack.c.bf16 %v598_v36, %v597_v35  ;;  %v784_v33 = vld [vmem:[#allocation8 + $0x268] sm:$0xff]  ;;  %v785_v35 = vld [vmem:[#allocation8 + $0x270] sm:$0xff]  ;;  %v786_v36 = vld [vmem:[#allocation8 + $0x278] sm:$0xff] }
  0x80   :  { %1663 = vmatprep.subr.bf16.mxu1 %v1950_v25  ;;  %v796_v57 = vld [vmem:[#allocation8 + $0x2c8] sm:$0xff] }
  0x81   :  { %1639 = vmatpush3.bf16.msra.mxu0 %v1638_v10 }
  0x82   :  { %1641 = vmatprep.subr.bf16.mxu0 %v1640_v11 }
  0x83   :  { %1665 = vmatpush3.bf16.msra.mxu1 %v1664_v40  ;;  %v1712_v40 = vpack.c.bf16 %v600_v39, %v599_v38  ;;  %v1078_v38 = vld [vmem:[#allocation8 + $0x210] ss:$0 sm:$0xff] }
  0x84   :  { %1666 = vmatprep.subr.bf16.mxu1 %v1950_v25 }
  0x85   :  { %1643 = vmatpush3.bf16.msra.mxu0 %v1642_v16 }
  0x86   :  { %1645 = vmatprep.subr.bf16.mxu0 %v1644_v17 }
  0x87   :  { %1668 = vmatpush3.bf16.msra.mxu1 %v1667_v43 }
  0x88   :  { %1669 = vmatprep.subr.bf16.mxu1 %v1950_v25 }
  0x89   :  { %1647 = vmatpush3.bf16.msra.mxu0 %v1646_v20  ;;  %v434_v20 = vld [vmem:[#allocation8 + $0xf8] sm:$0xff] }
  0x8a   :  { %1672 = vmatprep.subr.bf16.mxu0 %v1950_v25 }
  0x8b   :  { %1671 = vmatpush3.bf16.msra.mxu1 %v1670_v46  ;;  %v601_v46 = vld [vmem:[#allocation8 + $0x170] sm:$0xff] }
  0x8c   :  { %395 = vmatmul.mubr.f32.vlgmr.msra.gmra.mrb[2].mxu0 %v85_v21  ;;  %1696 = vmatprep.subr.bf16.mxu1 %v1950_v25  ;;  %v1694_v21 = vpack.c.bf16 %v434_v20, %v433_v19  ;;  %v1715_v49 = vpack.c.bf16 %v602_v48, %v601_v46  ;;  %v620_v19 = vld [vmem:[#allocation8 + $0x208] sm:$0xff]  ;;  %v789_v46 = vld [vmem:[#allocation8 + $0x290] sm:$0xff]  ;;  %v790_v48 = vld [vmem:[#allocation8 + $0x298] sm:$0xff] }
  0x8d   :  { %1374 = vmatprep.mubr.msk.f32.mxu0 %vm1951_vm0, %v1952_v47  ;;  %1674 = vmatpush3.bf16.msra.mxu0 %v1673_v51  ;;  %v604_v51 = vld [vmem:[#allocation8 + $0x188] sm:$0xff] }
  0x8e   :  { %1675 = vmatprep.subr.bf16.mxu0 %v1950_v25  ;;  %v1718_v52 = vpack.c.bf16 %v604_v51, %v603_v50  ;;  %v791_v50 = vld [vmem:[#allocation8 + $0x2a0] sm:$0xff]  ;;  %v792_v51 = vld [vmem:[#allocation8 + $0x2a8] sm:$0xff] }
  0x91   :  { %1677 = vmatpush3.bf16.msra.mxu0 %v1676_v53  ;;  %v605_v53 = vld [vmem:[#allocation8 + $0x190] sm:$0xff] }
  0x92   :  { %1678 = vmatprep.subr.bf16.mxu0 %v1950_v25 }
  0x95   :  { %1680 = vmatpush3.bf16.msra.mxu0 %v1679_v56  ;;  %v1721_v56 = vpack.c.bf16 %v606_v54, %v605_v53  ;;  %v1769_v53 = vpack.c.bf16 %v792_v51, %v791_v50  ;;  %v794_v54 = vld [vmem:[#allocation8 + $0x2b8] sm:$0xff] }
  0x96   :  { %1681 = vmatprep.subr.bf16.mxu0 %v1950_v25 }
  0x99   :  { %1683 = vmatpush3.bf16.msra.mxu0 %v1682_v59  ;;  %v609_v59 = vld [vmem:[#allocation8 + $0x1b0] sm:$0xff] }
  0x9a   :  { %1684 = vmatprep.subr.bf16.mxu0 %v1950_v25  ;;  %v1727_v61 = vpack.c.bf16 %v610_v60, %v609_v59  ;;  %v797_v59 = vld [vmem:[#allocation8 + $0x2d0] sm:$0xff]  ;;  %v798_v60 = vld [vmem:[#allocation8 + $0x2d8] sm:$0xff] }
  0x9d   :  { %1686 = vmatpush3.bf16.msra.mxu0 %v1685_v62  ;;  %v611_v62 = vld [vmem:[#allocation8 + $0x1c0] sm:$0xff] }
  0x9e   :  { %1687 = vmatprep.subr.bf16.mxu0 %v1950_v25  ;;  %v1730_v0 = vpack.c.bf16 %v612_v63, %v611_v62  ;;  %v799_v62 = vld [vmem:[#allocation8 + $0x2e0] sm:$0xff]  ;;  %v800_v63 = vld [vmem:[#allocation8 + $0x2e8] sm:$0xff] }
  0xa1   :  { %1689 = vmatpush3.bf16.msra.mxu0 %v1688_v1  ;;  %v613_v1 = vld [vmem:[#allocation8 + $0x1d0] sm:$0xff] }
  0xa2   :  { %1690 = vmatprep.subr.bf16.mxu0 %v1950_v25  ;;  %v1733_v3 = vpack.c.bf16 %v614_v2, %v613_v1  ;;  %v801_v1 = vld [vmem:[#allocation8 + $0x2f0] sm:$0xff]  ;;  %v802_v2 = vld [vmem:[#allocation8 + $0x2f8] sm:$0xff] }
  0xa5   :  { %1692 = vmatpush3.bf16.msra.mxu0 %v1691_v4  ;;  %v615_v4 = vld [vmem:[#allocation8 + $0x1e0] sm:$0xff] }
  0xa6   :  { %1693 = vmatprep.subr.bf16.mxu0 %v1950_v25 }
  0xa9   :  { %1695 = vmatpush3.bf16.msra.mxu0 %v1694_v21  ;;  %v775_v21 = vld [vmem:[#allocation8 + $0x220] sm:$0xff] }
  0xaa   :  { %1720 = vmatprep.subr.bf16.mxu0 %v1950_v25 }
 0x13f   :  { %v1115_v5 = vpop.f32.mrb[0].mxu0 }
 0x140   :  { %v1116_v7 = vpop.f32.mrb[1].mxu0 }
 0x141   :  { %v1150_v8 = vpop.f32.mrb[0].mxu1  ;;  %v1117_v9 = vadd.f32 %v1116_v7, %v1115_v5  ;;  %v616_v5 = vld [vmem:[#allocation8 + $0x1e8] sm:$0xff]  ;;  %v617_v7 = vld [vmem:[#allocation8 + $0x1f0] sm:$0xff] }
 0x142   :  { %v1151_v10 = vpop.f32.mrb[1].mxu1 }
 0x143   :  { %v1152_v11 = vadd.f32 %v1151_v10, %v1150_v8  ;;  %v257_v12 = vadd.f32 %v1117_v9, %v1075_v6  ;;  %v1736_v6 = vpack.c.bf16 %v616_v5, %v615_v4  ;;  %v618_v8 = vld [vmem:[#allocation8 + $0x1f8] sm:$0xff]  ;;  %v1077_v10 = vld [vmem:[#allocation8 + $0x108] ss:$0 sm:$0xff]  ;;  %v803_v4 = vld [vmem:[#allocation8 + $0x300] sm:$0xff] }
 0x144   :  { %v1739_v9 = vpack.c.bf16 %v618_v8, %v617_v7  ;;  %v804_v5 = vld [vmem:[#allocation8 + $0x308] sm:$0xff]  ;;  %v1079_v7 = vld [vmem:[#allocation8 + $0x218] ss:$0 sm:$0xff] }
 0x145   :  { %v327_v13 = vadd.f32 %v1152_v11, %v257_v12 }
 0x15f   :  { %v1185_v14 = vpop.f32.mrb[2].mxu0 }
 0x160   :  { %v1186_v15 = vpop.f32.mrb[3].mxu0 }
 0x161   :  { %v1187_v16 = vadd.f32 %v1186_v15, %v1185_v14 }
 0x163   :  { %v2070_v17 = vadd.f32 %v1187_v16, %v327_v13  ;;  %v619_v16 = vld [vmem:[#allocation8 + $0x200] sm:$0xff] }
 0x164   :  { %v1742_v20 = vpack.c.bf16 %v620_v19, %v619_v16  ;;  %v806_v16 = vld [vmem:[#allocation8 + $0x318] sm:$0xff] }
 0x165   :  { %v400_v18 = vmax.f32 %v2070_v17, 0.0  ;;  %v1745_v17 = vpack.c.bf16 %v776_v22, %v775_v21  ;;  %v965_v21 = vld [vmem:[#allocation9 + $0x8] sm:$0xff]  ;;  %v966_v22 = vld [vmem:[#allocation9 + $0x10] sm:$0xff] }
 0x167   :  { %1340 = vmatmul.mubr.f32.vlgmr.msra.gmra.mrb[2].mxu1 %v400_v18 }
 0x168   :  { %1409 = vmatprep.mubr.msk.f32.mxu1 %vm1951_vm0, %v1952_v47  ;;  %1698 = vmatpush3.bf16.msra.mxu1 %v1697_v26  ;;  %v779_v26 = vld [vmem:[#allocation8 + $0x240] sm:$0xff] }
 0x169   :  { %1699 = vmatprep.subr.bf16.mxu1 %v1950_v25 }
 0x16c   :  { %1701 = vmatpush3.bf16.msra.mxu1 %v1700_v28  ;;  %v1751_v28 = vpack.c.bf16 %v780_v27, %v779_v26  ;;  %v971_v26 = vld [vmem:[#allocation9 + $0x38] sm:$0xff] }
 0x16d   :  { %1702 = vmatprep.subr.bf16.mxu1 %v1950_v25 }
 0x170   :  { %1704 = vmatpush3.bf16.msra.mxu1 %v1703_v31  ;;  %v1754_v31 = vpack.c.bf16 %v782_v30, %v781_v29  ;;  %v973_v29 = vld [vmem:[#allocation9 + $0x48] sm:$0xff] }
 0x171   :  { %1705 = vmatprep.subr.bf16.mxu1 %v1950_v25 }
 0x174   :  { %1707 = vmatpush3.bf16.msra.mxu1 %v1706_v34  ;;  %v1757_v34 = vpack.c.bf16 %v784_v33, %v783_v32  ;;  %v975_v32 = vld [vmem:[#allocation9 + $0x58] sm:$0xff] }
 0x175   :  { %1708 = vmatprep.subr.bf16.mxu1 %v1950_v25 }
 0x178   :  { %1710 = vmatpush3.bf16.msra.mxu1 %v1709_v37  ;;  %v1760_v37 = vpack.c.bf16 %v786_v36, %v785_v35 }
 0x179   :  { %1711 = vmatprep.subr.bf16.mxu1 %v1950_v25 }
 0x17c   :  { %1713 = vmatpush3.bf16.msra.mxu1 %v1712_v40 }
 0x17d   :  { %1714 = vmatprep.subr.bf16.mxu1 %v1950_v25 }
 0x180   :  { %1716 = vmatpush3.bf16.msra.mxu1 %v1715_v49  ;;  %v1766_v49 = vpack.c.bf16 %v790_v48, %v789_v46 }
 0x181   :  { %1717 = vmatprep.subr.bf16.mxu1 %v1950_v25 }
 0x184   :  { %1719 = vmatpush3.bf16.msra.mxu1 %v1718_v52  ;;  %v793_v52 = vld [vmem:[#allocation8 + $0x2b0] sm:$0xff] }
 0x185   :  { %1744 = vmatprep.subr.bf16.mxu1 %v1950_v25  ;;  %v1772_v55 = vpack.c.bf16 %v794_v54, %v793_v52  ;;  %v1082_v52 = vld [vmem:[%s2153_s5] ss:$0 sm:$0xff] }
 0x23a   :  { %v507_v42 = vpop.f32.mrb[2].mxu1 }
 0x23b   :  { %v508_v43 = vadd.f32 %v1076_v41, %v507_v42  ;;  %v1341_v44 = vpop.f32.mrb[3].mxu1 }
 0x23c   :  { %v788_v44 = vld [vmem:[#allocation8 + $0x288] sm:$0xff] }
 0x23d   :  { %v511_v45 = vmax.f32 %v508_v43, 0.0  ;;  %v787_v43 = vld [vmem:[#allocation8 + $0x280] sm:$0xff] }
 0x23f   :  { %1375 = vmatmul.mubr.f32.vlgmr.msra.gmra.mrb[4].mxu0 %v511_v45  ;;  %v1763_v45 = vpack.c.bf16 %v788_v44, %v787_v43  ;;  %v979_v43 = vld [vmem:[#allocation9 + $0x78] sm:$0xff] }
 0x240   :  { %1444 = vmatprep.mubr.msk.f32.mxu0 %vm1951_vm0, %v1952_v47  ;;  %1722 = vmatpush3.bf16.msra.mxu0 %v1721_v56  ;;  %v795_v56 = vld [vmem:[#allocation8 + $0x2c0] sm:$0xff] }
 0x241   :  { %1723 = vmatprep.subr.bf16.mxu0 %v1950_v25 }
 0x244   :  { %1725 = vmatpush3.bf16.msra.mxu0 %v1724_v58  ;;  %v1775_v58 = vpack.c.bf16 %v796_v57, %v795_v56 }
 0x245   :  { %1726 = vmatprep.subr.bf16.mxu0 %v1950_v25 }
 0x248   :  { %1728 = vmatpush3.bf16.msra.mxu0 %v1727_v61  ;;  %v1778_v61 = vpack.c.bf16 %v798_v60, %v797_v59 }
 0x249   :  { %1729 = vmatprep.subr.bf16.mxu0 %v1950_v25 }
 0x24c   :  { %1731 = vmatpush3.bf16.msra.mxu0 %v1730_v0  ;;  %v1781_v0 = vpack.c.bf16 %v800_v63, %v799_v62 }
 0x24d   :  { %1732 = vmatprep.subr.bf16.mxu0 %v1950_v25 }
 0x250   :  { %1734 = vmatpush3.bf16.msra.mxu0 %v1733_v3  ;;  %v1784_v3 = vpack.c.bf16 %v802_v2, %v801_v1 }
 0x251   :  { %1735 = vmatprep.subr.bf16.mxu0 %v1950_v25 }
 0x254   :  { %1737 = vmatpush3.bf16.msra.mxu0 %v1736_v6  ;;  %v1787_v6 = vpack.c.bf16 %v804_v5, %v803_v4 }
 0x255   :  { %1738 = vmatprep.subr.bf16.mxu0 %v1950_v25 }
 0x258   :  { %1740 = vmatpush3.bf16.msra.mxu0 %v1739_v9 }
 0x259   :  { %1741 = vmatprep.subr.bf16.mxu0 %v1950_v25 }
 0x25c   :  { %1743 = vmatpush3.bf16.msra.mxu0 %v1742_v20  ;;  %v964_v20 = vld [vmem:[#allocation9] sm:$0xff] }
 0x25d   :  { %1768 = vmatprep.subr.bf16.mxu0 %v1950_v25 }
 0x312   :  { %v582_v11 = vpop.f32.mrb[4].mxu0 }
 0x313   :  { %v583_v12 = vadd.f32 %v1077_v10, %v582_v11  ;;  %v1376_v13 = vpop.f32.mrb[5].mxu0 }
 0x314   :  { %v805_v13 = vld [vmem:[#allocation8 + $0x310] sm:$0xff] }
 0x315   :  { %v2097_v14 = vadd.f32 %v583_v12, %v400_v18  ;;  %v778_v18 = vld [vmem:[#allocation8 + $0x238] sm:$0xff]  ;;  %v1790_v19 = vpack.c.bf16 %v806_v16, %v805_v13 }
 0x316   :  { %v1748_v24 = vpack.c.bf16 %v778_v18, %v777_v23  ;;  %v1793_v23 = vpack.c.bf16 %v965_v21, %v964_v20 }
 0x317   :  { %v587_v15 = vmax.f32 %v2097_v14, 0.0  ;;  %v968_v14 = vld [vmem:[#allocation9 + $0x20] sm:$0xff] }
 0x319   :  { %1410 = vmatmul.mubr.f32.vlgmr.msra.gmra.mrb[4].mxu1 %v587_v15 }
 0x31a   :  { %1479 = vmatprep.mubr.msk.f32.mxu1 %vm1951_vm0, %v1952_v47  ;;  %1746 = vmatpush3.bf16.msra.mxu1 %v1745_v17  ;;  %v967_v17 = vld [vmem:[#allocation9 + $0x18] sm:$0xff] }
 0x31b   :  { %1747 = vmatprep.subr.bf16.mxu1 %v1950_v25  ;;  %v1796_v18 = vpack.c.bf16 %v967_v17, %v966_v22 }
 0x31e   :  { %1749 = vmatpush3.bf16.msra.mxu1 %v1748_v24 }
 0x31f   :  { %1750 = vmatprep.subr.bf16.mxu1 %v1950_v25 }
 0x322   :  { %1752 = vmatpush3.bf16.msra.mxu1 %v1751_v28  ;;  %v972_v28 = vld [vmem:[#allocation9 + $0x40] sm:$0xff] }
 0x323   :  { %1753 = vmatprep.subr.bf16.mxu1 %v1950_v25  ;;  %v1805_v30 = vpack.c.bf16 %v973_v29, %v972_v28 }
 0x326   :  { %1755 = vmatpush3.bf16.msra.mxu1 %v1754_v31  ;;  %v974_v31 = vld [vmem:[#allocation9 + $0x50] sm:$0xff] }
 0x327   :  { %1756 = vmatprep.subr.bf16.mxu1 %v1950_v25  ;;  %v1808_v33 = vpack.c.bf16 %v975_v32, %v974_v31 }
 0x32a   :  { %1758 = vmatpush3.bf16.msra.mxu1 %v1757_v34  ;;  %v1080_v34 = vld [vmem:[#allocation8 + $0x320] ss:$0 sm:$0xff] }
 0x32b   :  { %1759 = vmatprep.subr.bf16.mxu1 %v1950_v25 }
 0x32e   :  { %1761 = vmatpush3.bf16.msra.mxu1 %v1760_v37 }
 0x32f   :  { %1762 = vmatprep.subr.bf16.mxu1 %v1950_v25 }
 0x332   :  { %1764 = vmatpush3.bf16.msra.mxu1 %v1763_v45  ;;  %v1081_v45 = vld [vmem:[#allocation8 + $0x328] ss:$0 sm:$0xff] }
 0x333   :  { %1765 = vmatprep.subr.bf16.mxu1 %v1950_v25 }
 0x336   :  { %1767 = vmatpush3.bf16.msra.mxu1 %v1766_v49 }
 0x337   :  { %1792 = vmatprep.subr.bf16.mxu1 %v1950_v25 }
 0x3ec   :  { %v693_v39 = vpop.f32.mrb[4].mxu1 }
 0x3ed   :  { %v694_v40 = vadd.f32 %v1078_v38, %v693_v39  ;;  %v1411_v41 = vpop.f32.mrb[5].mxu1  ;;  %v976_v39 = vld [vmem:[#allocation9 + $0x60] sm:$0xff] }
 0x3ef   :  { %v697_v42 = vmax.f32 %v694_v40, 0.0  ;;  %v977_v40 = vld [vmem:[#allocation9 + $0x68] sm:$0xff] }
 0x3f0   :  { %v1811_v41 = vpack.c.bf16 %v977_v40, %v976_v39 }
 0x3f1   :  { %1445 = vmatmul.mubr.f32.vlgmr.msra.gmra.mrb[6].mxu0 %v697_v42  ;;  %v978_v42 = vld [vmem:[#allocation9 + $0x70] sm:$0xff] }
 0x3f2   :  { %1514 = vmatprep.mubr.msk.f32.mxu0 %vm1951_vm0, %v1952_v47  ;;  %1770 = vmatpush3.bf16.msra.mxu0 %v1769_v53  ;;  %v1814_v44 = vpack.c.bf16 %v979_v43, %v978_v42 }
 0x3f3   :  { %1771 = vmatprep.subr.bf16.mxu0 %v1950_v25 }
 0x3f6   :  { %1773 = vmatpush3.bf16.msra.mxu0 %v1772_v55 }
 0x3f7   :  { %1774 = vmatprep.subr.bf16.mxu0 %v1950_v25 }
 0x3fa   :  { %1776 = vmatpush3.bf16.msra.mxu0 %v1775_v58 }
 0x3fb   :  { %1777 = vmatprep.subr.bf16.mxu0 %v1950_v25 }
 0x3fe   :  { %1779 = vmatpush3.bf16.msra.mxu0 %v1778_v61 }
 0x3ff   :  { %1780 = vmatprep.subr.bf16.mxu0 %v1950_v25 }
 0x402   :  { %1782 = vmatpush3.bf16.msra.mxu0 %v1781_v0 }
 0x403   :  { %1783 = vmatprep.subr.bf16.mxu0 %v1950_v25 }
 0x406   :  { %1785 = vmatpush3.bf16.msra.mxu0 %v1784_v3 }
 0x407   :  { %1786 = vmatprep.subr.bf16.mxu0 %v1950_v25 }
 0x40a   :  { %1788 = vmatpush3.bf16.msra.mxu0 %v1787_v6 }
 0x40b   :  { %1789 = vmatprep.subr.bf16.mxu0 %v1950_v25 }
 0x40e   :  { %1791 = vmatpush3.bf16.msra.mxu0 %v1790_v19 }
 0x4c4   :  { %v768_v8 = vpop.f32.mrb[6].mxu0 }
 0x4c5   :  { %v769_v9 = vadd.f32 %v1079_v7, %v768_v8  ;;  %v1446_v10 = vpop.f32.mrb[7].mxu0 }
 0x4c7   :  { %v772_v11 = vadd.f32 %v769_v9, %v587_v15  ;;  %v969_v15 = vld [vmem:[#allocation9 + $0x28] sm:$0xff] }
 0x4c8   :  { %v1799_v24 = vpack.c.bf16 %v969_v15, %v968_v14 }
 0x4c9   :  { %v773_v12 = vmax.f32 %v772_v11, 0.0 }
 0x4cb   :  { %1480 = vmatmul.mubr.f32.vlgmr.msra.gmra.mrb[6].mxu1 %v773_v12 }
 0x4cc   :  { %1549 = vmatprep.mubr.msk.f32.mxu1 %vm1951_vm0, %v1952_v47  ;;  %1794 = vmatpush3.bf16.msra.mxu1 %v1793_v23  ;;  %v970_v47 = vld [vmem:[#allocation9 + $0x30] sm:$0xff] }
 0x4cd   :  { %1795 = vmatprep.subr.bf16.mxu1 %v1950_v25  ;;  %v1802_v27 = vpack.c.bf16 %v971_v26, %v970_v47 }
 0x4d0   :  { %1797 = vmatpush3.bf16.msra.mxu1 %v1796_v18 }
 0x4d1   :  { %1798 = vmatprep.subr.bf16.mxu1 %v1950_v25 }
 0x4d4   :  { %1800 = vmatpush3.bf16.msra.mxu1 %v1799_v24 }
 0x4d5   :  { %1801 = vmatprep.subr.bf16.mxu1 %v1950_v25 }
 0x4d8   :  { %1803 = vmatpush3.bf16.msra.mxu1 %v1802_v27 }
 0x4d9   :  { %1804 = vmatprep.subr.bf16.mxu1 %v1950_v25 }
 0x4dc   :  { %1806 = vmatpush3.bf16.msra.mxu1 %v1805_v30 }
 0x4dd   :  { %1807 = vmatprep.subr.bf16.mxu1 %v1950_v25 }
 0x4e0   :  { %1809 = vmatpush3.bf16.msra.mxu1 %v1808_v33 }
 0x4e1   :  { %1810 = vmatprep.subr.bf16.mxu1 %v1950_v25 }
 0x4e4   :  { %1812 = vmatpush3.bf16.msra.mxu1 %v1811_v41 }
 0x4e5   :  { %1813 = vmatprep.subr.bf16.mxu1 %v1950_v25 }
 0x4e8   :  { %1815 = vmatpush3.bf16.msra.mxu1 %v1814_v44 }
 0x59e   :  { %v879_v35 = vpop.f32.mrb[6].mxu1 }
 0x59f   :  { %v880_v36 = vadd.f32 %v1080_v34, %v879_v35  ;;  %v1481_v37 = vpop.f32.mrb[7].mxu1 }
 0x5a1   :  { %v883_v38 = vmax.f32 %v880_v36, 0.0 }
 0x5a3   :  { %1515 = vmatmul.mubr.f32.vlgmr.msra.gmra.mrb[8].mxu0 %v883_v38 }
 0x676   :  { %v954_v46 = vpop.f32.mrb[8].mxu0 }
 0x677   :  { %v955_v48 = vadd.f32 %v1081_v45, %v954_v46  ;;  %v1516_v49 = vpop.f32.mrb[9].mxu0 }
 0x679   :  { %v958_v50 = vadd.f32 %v955_v48, %v773_v12 }
 0x67b   :  { %v959_v51 = vmax.f32 %v958_v50, 0.0 }
 0x67d   :  { %1550 = vmatmul.mubr.f32.vlgmr.msra.gmra.mrb[8].mxu1 %v959_v51 }
 0x750   :  { %v1053_v53 = vpop.f32.mrb[8].mxu1 }
 0x751   :  { %v1054_v54 = vadd.f32 %v1082_v52, %v1053_v53  ;;  %v1551_v25 = vpop.f32.mrb[9].mxu1 }
 0x753   :  { %1057 = vst [vmem:[#allocation11] sm:$0xff] %v1054_v54 }
 0x754   :  { %1925 = shalt.err (!%p1922_p8)
}
 0x755   :  { %s1926_s26 = scalar_lea.hbm %s2154_s6, 128 }
 0x756   :  { %p1927_p9 = scmp.ne.s32.totalorder %s2154_s6, %s1926_s26  ;;  %p1930_p10 = scmp.lt.u32.totalorder %s1926_s26, %s2154_s6 }
 0x758   :  { %p1932_p11 = pnand %p1930_p10, %p1927_p9 }
 0x75a   :  { %1935 = shalt.err (!%p1932_p11)
}
 0x75b   :  { %1067 = dma.vmem_to_hbm [thread:$0]  %s1065_s22, 128, %s2154_s6, [#allocation5]  }
 0x75c   :  { %1942 = dma.done.wait [#allocation5], 128  }
 0x75d   :  { %1943 = vsyncadd [#allocation5], 4294967168 }
 0x75e   :  { %1071 = vsyncpa [#allocation4], 1 }
 0x75f   :  { %1072 = vsyncpa [#allocation7], 1 }
 0x760   :  { %1073 = vsyncpa [#allocation10], 1 }
 0x761   :  { %1074 = vsyncpa [#allocation5], 1 }

</bundles_post_ra>
